<compile_context>
chip_gen: v7x
topology: tpu7x:2x2x1
jax: 0.10.0
libtpu: 0.0.40
codegen_flags: <defaults>
</compile_context>

<pallas_src>
import functools
import math

import jax
import jax.numpy as jnp
from jax.experimental import pallas as pl
from jax.experimental.pallas import tpu as pltpu


def _interp_matrix(in_size: int, out_size: int) -> jnp.ndarray:
    """Row-stochastic (out_size, in_size) bilinear weight matrix, align_corners=True.

    Always built in float32 (cast to the operand dtype only at the very end).
    """
    if out_size == 1:
        src = jnp.zeros((1,), dtype=jnp.float32)
    else:
        src = jnp.arange(out_size, dtype=jnp.float32) * (
            (in_size - 1) / (out_size - 1)
        )
    lo = jnp.clip(jnp.floor(src).astype(jnp.int32), 0, in_size - 1)
    hi = jnp.minimum(lo + 1, in_size - 1)
    frac = src - lo.astype(jnp.float32)
    rows = jnp.arange(out_size)
    a = jnp.zeros((out_size, in_size), dtype=jnp.float32)
    a = a.at[rows, lo].add(1.0 - frac)
    a = a.at[rows, hi].add(frac)
    return a


# ----------------- Kron path: lane-dense batched matmul ----------------------

def _kron_kernel(w_ref, x_ref, o_ref):
    # w_ref: (HW_in, TN) slab of kron(A_h, A_w)^T
    # x_ref: (TB, HW_in)  batch of flattened input planes
    # o_ref: (TB, TN)     lane-dense output slab
    o_ref[...] = jnp.dot(
        x_ref[...], w_ref[...], preferred_element_type=jnp.float32
    ).astype(o_ref.dtype)


# ----------------- Fallback path: per-plane, H_out-tiled ---------------------

def _plane_kernel(ah_ref, awt_ref, x_ref, o_ref):
    # ah_ref:  (TH, H_in) tile of A_h
    # awt_ref: (W_in, W_out) constant (single-buffered)
    # x_ref:   (H_in, W_in) full input plane (leading NC axis squeezed)
    # o_ref:   (TH, W_out) output tile
    tmp = jnp.dot(ah_ref[...], x_ref[...], preferred_element_type=jnp.float32)
    out = jnp.dot(
        tmp,  # keep the intermediate in f32 (matches kron-path numerics)
        awt_ref[...].astype(jnp.float32),
        preferred_element_type=jnp.float32,
    )
    o_ref[...] = out.astype(o_ref.dtype)


_ROWS_PER_BLOCK = 512                 # planes per grid step (kron path)
_KRON_WEIGHT_BYTES_LIMIT = 8 << 20    # kron weight must stay well inside VMEM;
                                      # also caps redundant-FLOP / compute-bound cases
_XO_BUDGET_BYTES = 24 << 20           # budget for double-buffered x / out blocks


def _round_up(v: int, m: int) -> int:
    return ((v + m - 1) // m) * m


def _clamp_vmem_limit(needed_bytes: int) -> int:
    # Give headroom, but never ask for more than is safe on v7x (64 MiB physical).
    return int(min(max(int(needed_bytes * 1.25) + (2 << 20), 16 << 20), 48 << 20))


def _pick_tb(nc: int, hw_in: int, hw_out_pad: int, out_itemsize: int,
             sub: int) -> int:
    if nc <= sub:
        return nc                       # full-dim block (always legal)
    # Cap TB so the double-buffered x + out blocks stay inside the budget.
    per_row = 2 * (hw_in + hw_out_pad) * out_itemsize
    cap = max(sub, (_XO_BUDGET_BYTES // per_row) // sub * sub)
    tb = min(_ROWS_PER_BLOCK, cap)
    # Prefer >= 2 grid steps over the plane axis (v7x has 2 TensorCores).
    half = _round_up(pl.cdiv(nc, 2), sub)
    tb = min(tb, max(sub, half))
    return max(sub, tb)


@functools.partial(
    jax.jit,
    static_argnames=("scale_factor", "mode", "force_plane_path",
                     "prefer_bf16_matmul"),
)
def upsample(x, *, scale_factor=2, mode="bilinear", force_plane_path=False,
             prefer_bf16_matmul=False):
    """Equivalent of F.interpolate(x, scale_factor=scale_factor, mode=mode,
    align_corners=True) for NCHW inputs.

    prefer_bf16_matmul: opt-in (recommended on v5e) -- feed the MXU bf16
    operands while still accumulating in f32.  Off by default so the f32 path
    keeps its exact numerics.
    """
    assert mode == "bilinear", "only bilinear mode implemented"
    # TODO(synk): other interpolate modes (nearest/bicubic/trilinear) not implemented.
    n, c, h_in, w_in = x.shape
    h_out = int(math.floor(h_in * scale_factor))
    w_out = int(math.floor(w_in * scale_factor))

    # Interpolation matrices are always computed in float32 (no double rounding).
    a_h32 = _interp_matrix(h_in, h_out)   # (H_out, H_in), f32
    a_w32 = _interp_matrix(w_in, w_out)   # (W_out, W_in), f32

    nc = n * c
    hw_in = h_in * w_in
    hw_out = h_out * w_out
    hw_out_pad = _round_up(hw_out, 128)   # lane-dense output stores
    out_itemsize = jnp.dtype(x.dtype).itemsize

    op_dtype = jnp.bfloat16 if prefer_bf16_matmul else x.dtype
    op_itemsize = jnp.dtype(op_dtype).itemsize

    weight_bytes = hw_in * hw_out_pad * op_itemsize
    use_kron = (weight_bytes <= _KRON_WEIGHT_BYTES_LIMIT) and not force_plane_path

    if use_kron:
        # Kron product built entirely in f32, cast once to the operand dtype.
        w_kron_t = jnp.kron(a_h32, a_w32).T               # (HW_in, HW_out), f32
        if hw_out_pad != hw_out:
            w_kron_t = jnp.pad(w_kron_t, ((0, 0), (0, hw_out_pad - hw_out)))
        w_kron_t = w_kron_t.astype(op_dtype)
        x2 = x.reshape(nc, hw_in).astype(op_dtype)

        sub = max(8, 32 // op_itemsize)                   # sublane granularity
        tb = _pick_tb(nc, hw_in, hw_out_pad, out_itemsize, sub)
        n_i = pl.cdiv(nc, tb)

        # If the plane axis gives only one grid step, split hw_out instead so
        # both v7x TensorCores still get work.
        if n_i >= 2 or hw_out_pad < 2 * 128:
            tn = hw_out_pad
        else:
            tn = _round_up(pl.cdiv(hw_out_pad, 2), 128)
        n_j = pl.cdiv(hw_out_pad, tn)

        # Single-buffer the weight only when its block never moves.
        w_spec_kwargs = {}
        w_buffers = 2
        if n_j == 1:
            w_spec_kwargs["pipeline_mode"] = pl.Buffered(1)
            w_buffers = 1
        w_spec = pl.BlockSpec((hw_in, tn), lambda i, j: (0, j), **w_spec_kwargs)
        x_spec = pl.BlockSpec((tb, hw_in), lambda i, j: (i, 0))
        o_spec = pl.BlockSpec((tb, tn), lambda i, j: (i, j))

        needed = (w_buffers * hw_in * tn * op_itemsize
                  + 2 * tb * hw_in * op_itemsize
                  + 2 * tb * tn * out_itemsize)
        out2 = pl.pallas_call(
            _kron_kernel,
            out_shape=jax.ShapeDtypeStruct((nc, hw_out_pad), x.dtype),
            grid_spec=pltpu.PrefetchScalarGridSpec(
                num_scalar_prefetch=0,
                grid=(n_i, n_j),
                in_specs=[w_spec, x_spec],
                out_specs=o_spec,
            ),
            compiler_params=pltpu.CompilerParams(
                dimension_semantics=("parallel", "parallel"),
                vmem_limit_bytes=_clamp_vmem_limit(needed),
            ),
        )(w_kron_t, x2)
        if hw_out_pad != hw_out:
            out2 = out2[:, :hw_out]
        return out2.reshape(n, c, h_out, w_out)

    # ---------------- Fallback: per-plane, tiled over H_out ------------------
    a_h = a_h32.astype(x.dtype)                           # (H_out, H_in)
    a_w_t = a_w32.T.astype(x.dtype)                       # (W_in, W_out)
    x_flat = x.reshape(nc, h_in, w_in)

    th = h_out if h_out <= 512 else 256                   # multiple of 8 / full dim
    n_h = pl.cdiv(h_out, th)

    needed = (2 * th * h_in * out_itemsize                # A_h tile x2
              + w_in * w_out * out_itemsize               # A_w^T x1 (Buffered(1))
              + 2 * h_in * w_in * out_itemsize            # x plane x2
              + 2 * th * w_out * out_itemsize             # out tile x2
              + th * w_in * 4)                            # f32 intermediate
    out_flat = pl.pallas_call(
        _plane_kernel,
        out_shape=jax.ShapeDtypeStruct((nc, h_out, w_out), x.dtype),
        grid_spec=pltpu.PrefetchScalarGridSpec(
            num_scalar_prefetch=0,
            grid=(nc, n_h),
            in_specs=[
                pl.BlockSpec((th, h_in), lambda i, j: (j, 0)),
                pl.BlockSpec((w_in, w_out), lambda i, j: (0, 0),
                             pipeline_mode=pl.Buffered(1)),
                pl.BlockSpec((pl.Squeezed(), h_in, w_in), lambda i, j: (i, 0, 0)),
            ],
            out_specs=pl.BlockSpec(
                (pl.Squeezed(), th, w_out), lambda i, j: (i, j, 0)
            ),
        ),
        compiler_params=pltpu.CompilerParams(
            dimension_semantics=("parallel", "parallel"),
            vmem_limit_bytes=_clamp_vmem_limit(needed),
        ),
    )(a_h, a_w_t, x_flat)
    return out_flat.reshape(n, c, h_out, w_out)


if __name__ == "__main__":
    key = jax.random.PRNGKey(0)
    x = jax.random.normal(key, (2, 4, 16, 16), dtype=jnp.float32)

    scale_factor = 2
    y = upsample(x, scale_factor=scale_factor, mode="bilinear")
    y = jax.block_until_ready(y)

    # Sanity checks: shape and align_corners=True corner preservation.
    assert y.shape == (2, 4, 32, 32), y.shape
    corners_in = x[:, :, [0, 0, -1, -1], [0, -1, 0, -1]]
    corners_out = y[:, :, [0, 0, -1, -1], [0, -1, 0, -1]]
    assert jnp.allclose(corners_in, corners_out, atol=1e-5), "corner mismatch"

    # Full reference computed in plain JAX with the same weight matrices.
    a_h = _interp_matrix(16, 32)
    a_w = _interp_matrix(16, 32)
    ref = jnp.einsum("oh,nchw,pw->ncop", a_h, x, a_w)
    assert jnp.allclose(y, ref, atol=1e-5, rtol=1e-5), "value mismatch (kron path)"

    # Also exercise the per-plane fallback path once (used for large spatial dims).
    y2 = upsample(x, scale_factor=scale_factor, mode="bilinear",
                  force_plane_path=True)
    y2 = jax.block_until_ready(y2)
    assert jnp.allclose(y2, ref, atol=1e-5, rtol=1e-5), "value mismatch (plane path)"

    print("KERNEL_OK")
</pallas_src>

<mosaic_0001>
module attributes {stable_mosaic.version = 11 : i64} {
  func.func private @main(%arg0: i32) attributes {dimension_semantics = [#tpu.dimension_semantics<core_parallel>], iteration_bounds = array<i64: 2>, tpu.core_type = #tpu.core_type<sc_scalar_subcore>, window_params = []} {
    return
  }
}

module attributes {stable_mosaic.version = 11 : i64} {
  func.func private @main(%arg0: i32) attributes {dimension_semantics = [#tpu.dimension_semantics<core_parallel>], iteration_bounds = array<i64: 2>, tpu.core_type = #tpu.core_type<sc_scalar_subcore>, window_params = []} {
    return
  }
}

module attributes {stable_mosaic.version = 11 : i64} {
  func.func @_kron_kernel(%arg0: i32, %arg1: i32, %arg2: memref<256x512xf32, #tpu.memory_space<vmem>>, %arg3: memref<8x256xf32, #tpu.memory_space<vmem>>, %arg4: memref<8x512xf32, #tpu.memory_space<vmem>>) attributes {dimension_semantics = [#tpu.dimension_semantics<parallel>, #tpu.dimension_semantics<parallel>], iteration_bounds = array<i64: 1, 2>, scalar_prefetch = 0 : i64, scratch_operands = 0 : i64, tpu.core_type = #tpu.core_type<tc>, window_params = [{transform_indices = @transform_0, window_bounds = array<i64: 256, 512>}, {transform_indices = @transform_1, window_bounds = array<i64: 8, 256>}, {transform_indices = @transform_2, window_bounds = array<i64: 8, 512>}]} {
    %c0 = arith.constant 0 : index
    %c0_0 = arith.constant 0 : index
    %0 = vector.load %arg3[%c0, %c0_0] : memref<8x256xf32, #tpu.memory_space<vmem>>, vector<8x256xf32>
    %c0_1 = arith.constant 0 : index
    %c0_2 = arith.constant 0 : index
    %1 = vector.load %arg2[%c0_1, %c0_2] : memref<256x512xf32, #tpu.memory_space<vmem>>, vector<256x512xf32>
    %cst = arith.constant dense<0.000000e+00> : vector<8x512xf32>
    %2 = tpu.matmul %0, %1, %cst {dimension_numbers = #tpu.dot_dimension_numbers<[1], [0], [0], [1], [0, 0, 1, 1], [], []>} : vector<8x256xf32>, vector<256x512xf32>, vector<8x512xf32> -> vector<8x512xf32>
    %c0_3 = arith.constant 0 : index
    %c0_4 = arith.constant 0 : index
    %3 = vector.load %arg4[%c0_3, %c0_4] : memref<8x512xf32, #tpu.memory_space<vmem>>, vector<8x512xf32>
    tpu.vector_store %arg4[%c0_3, %c0_4], %2 {strides = array<i32>} : memref<8x512xf32, #tpu.memory_space<vmem>>, vector<8x512xf32>,
    return
  }
  func.func @transform_0(%arg0: i32, %arg1: i32) -> (i32, i32) {
    %c0_i32 = arith.constant 0 : i32
    %c0_i32_0 = arith.constant 0 : i32
    return %c0_i32, %arg1 : i32, i32
  }
  func.func @transform_1(%arg0: i32, %arg1: i32) -> (i32, i32) {
    %c0_i32 = arith.constant 0 : i32
    %c0_i32_0 = arith.constant 0 : i32
    return %arg0, %c0_i32 : i32, i32
  }
  func.func @transform_2(%arg0: i32, %arg1: i32) -> (i32, i32) {
    %c0_i32 = arith.constant 0 : i32
    return %arg0, %arg1 : i32, i32
  }
}

</mosaic_0001>

<bundles_post_ra>
// kernel: upsample.1
= control target key start
LH: loop header
LB: loop body
LE: loop exit
PB: predicated region body
PF: predicated region fallthrough
CT: control target
= control target key end

     0   :  { %s1078_s9 = smov 0   ;;  %s1080_s10 = smov 0   ;;  %s1539_s0 = inlined_call_operand.vmem [shape: f32[256,1024], index: 0, kind: input, shape index: {}]   ;;  %s1540_s1 = inlined_call_operand.vmem [shape: f32[8,256], index: 1, kind: input, shape index: {}]   ;;  %s1541_s2 = inlined_call_operand.vmem [shape: f32[8,1024], index: 2, kind: output, shape index: {}]  }
   0x1   :  { %s1082_s11 = smov 0   ;;  %s1084_s12 = smov 0  }
   0x2   :  { %s1086_s13 = smov 0  }
   0x3 LB: > { %s21_s14 = sadd.s32 1, %s1057_s12  ;;  %p38_p1 = scmp.ne.s32.totalorder %s1049_s10, %s1045_s9  ;;  %s1061_s13 = sphi %s1086_s13, %s12_s13   ;;  %s1057_s12 = sphi %s1084_s12, %s1545_s12   ;;  %s1053_s11 = sphi %s1082_s11, %s1544_s11   ;;  %s1049_s10 = sphi %s1080_s10, %s1543_s10   ;;  %s1045_s9 = sphi %s1078_s9, %s1542_s9  }
   0x4   : > { %p22_p0 = scmp.ge.s32.totalorder %s21_s14, 2  ;;  %p39_p2 = scmp.eq.s32.totalorder %s1061_s13, 0 }
   0x5   : > { %s31_s16 = sadd.s32 1, %s1049_s10  ;;  %p844_p5 = scmp.ge.s32.totalorder %s1061_s13, 2 }
   0x6   : > { %s1547_s14 = smov (%p22_p0, %s21_s14), 0  ;;  %p40_p3 = por %p39_p2, %p38_p1 }
   0x7   : > { %s28_s15 = ssub.s32 %s1057_s12, %s1547_s14  ;;  %126 = sbr.rel (%p844_p5) target bundleno = 82 (0x52), region = 20 }
   0x8   : > { %p29_p4 = scmp.eq.s32.totalorder %s28_s15, 0 }
   0xa   : > { %s1113_s17 = scalar_select %p29_p4, %s1049_s10, %s31_s16  }
   0xe   : > { %129 = sbr.rel (!%p40_p3) target bundleno = 82 (0x52), region = 24  ;;  %s131_s18 = sand.u32 (%p40_p3), 1, %s1049_s10  }
   0xf   : > { %s854_s19 = sshll.u32 (%p40_p3), %s1057_s12, 5  ;;  %s845_s20 = sshll.u32 (%p40_p3), %s131_s18, 10 }
  0x10   : > { %s1121_s23 = scalar_lea.vmem (%p40_p3), %s1539_s0, %s854_s19  ;;  %s1126_s24 = scalar_lea.vmem (%p40_p3), [#allocation2], %s845_s20 }
  0x11   : > { %v149_v0 = vld [vmem:[%s1121_s23] sm:$0xff] (%p40_p3)  ;;  %v151_v1 = vld [vmem:[%s1121_s23 + $0x8] sm:$0xff] (%p40_p3)  ;;  %v153_v2 = vld [vmem:[%s1121_s23 + $0x10] sm:$0xff] (%p40_p3) }
  0x12   : > { %150 = vst [vmem:[%s1126_s24] sm:$0xff] (%p40_p3), %v149_v0  ;;  %152 = vst [vmem:[%s1126_s24 + $0x8] sm:$0xff] (%p40_p3), %v151_v1  ;;  %v155_v3 = vld [vmem:[%s1121_s23 + $0x18] sm:$0xff] (%p40_p3)  ;;  %v157_v4 = vld [vmem:[%s1121_s23 + $0x40] sm:$0xff] (%p40_p3) }
  0x13   : > { %154 = vst [vmem:[%s1126_s24 + $0x10] sm:$0xff] (%p40_p3), %v153_v2  ;;  %v159_v5 = vld [vmem:[%s1121_s23 + $0x48] sm:$0xff] (%p40_p3)  ;;  %156 = vst [vmem:[%s1126_s24 + $0x18] sm:$0xff] (%p40_p3), %v155_v3  ;;  %v161_v6 = vld [vmem:[%s1121_s23 + $0x50] sm:$0xff] (%p40_p3) }
  0x14   : > { %158 = vst [vmem:[%s1126_s24 + $0x20] sm:$0xff] (%p40_p3), %v157_v4  ;;  %160 = vst [vmem:[%s1126_s24 + $0x28] sm:$0xff] (%p40_p3), %v159_v5  ;;  %v163_v7 = vld [vmem:[%s1121_s23 + $0x58] sm:$0xff] (%p40_p3)  ;;  %v165_v8 = vld [vmem:[%s1121_s23 + $0x80] sm:$0xff] (%p40_p3) }
  0x15   : > { %162 = vst [vmem:[%s1126_s24 + $0x30] sm:$0xff] %v161_v6  ;;  %164 = vst [vmem:[%s1126_s24 + $0x38] sm:$0xff] %v163_v7  ;;  %v167_v9 = vld [vmem:[%s1121_s23 + $0x88] sm:$0xff]  ;;  %v169_v10 = vld [vmem:[%s1121_s23 + $0x90] sm:$0xff] }
  0x16   : > { %166 = vst [vmem:[%s1126_s24 + $0x40] sm:$0xff] %v165_v8  ;;  %v171_v11 = vld [vmem:[%s1121_s23 + $0x98] sm:$0xff]  ;;  %168 = vst [vmem:[%s1126_s24 + $0x48] sm:$0xff] %v167_v9  ;;  %v173_v12 = vld [vmem:[%s1121_s23 + $0xc0] sm:$0xff] }
  0x17   : > { %170 = vst [vmem:[%s1126_s24 + $0x50] sm:$0xff] %v169_v10  ;;  %172 = vst [vmem:[%s1126_s24 + $0x58] sm:$0xff] %v171_v11  ;;  %v175_v13 = vld [vmem:[%s1121_s23 + $0xc8] sm:$0xff]  ;;  %v177_v14 = vld [vmem:[%s1121_s23 + $0xd0] sm:$0xff] }
  0x18   : > { %174 = vst [vmem:[%s1126_s24 + $0x60] sm:$0xff] %v173_v12  ;;  %176 = vst [vmem:[%s1126_s24 + $0x68] sm:$0xff] %v175_v13  ;;  %v179_v15 = vld [vmem:[%s1121_s23 + $0xd8] sm:$0xff]  ;;  %v181_v16 = vld [vmem:[%s1121_s23 + $0x100] sm:$0xff] }
  0x19   : > { %178 = vst [vmem:[%s1126_s24 + $0x70] sm:$0xff] %v177_v14  ;;  %v183_v17 = vld [vmem:[%s1121_s23 + $0x108] sm:$0xff]  ;;  %180 = vst [vmem:[%s1126_s24 + $0x78] sm:$0xff] %v179_v15  ;;  %v185_v18 = vld [vmem:[%s1121_s23 + $0x110] sm:$0xff] }
  0x1a   : > { %182 = vst [vmem:[%s1126_s24 + $0x80] sm:$0xff] %v181_v16  ;;  %184 = vst [vmem:[%s1126_s24 + $0x88] sm:$0xff] %v183_v17  ;;  %v187_v19 = vld [vmem:[%s1121_s23 + $0x118] sm:$0xff]  ;;  %v189_v20 = vld [vmem:[%s1121_s23 + $0x140] sm:$0xff] }
  0x1b   : > { %186 = vst [vmem:[%s1126_s24 + $0x90] sm:$0xff] %v185_v18  ;;  %188 = vst [vmem:[%s1126_s24 + $0x98] sm:$0xff] %v187_v19  ;;  %v191_v21 = vld [vmem:[%s1121_s23 + $0x148] sm:$0xff]  ;;  %v193_v22 = vld [vmem:[%s1121_s23 + $0x150] sm:$0xff] }
  0x1c   : > { %190 = vst [vmem:[%s1126_s24 + $0xa0] sm:$0xff] %v189_v20  ;;  %v195_v23 = vld [vmem:[%s1121_s23 + $0x158] sm:$0xff]  ;;  %192 = vst [vmem:[%s1126_s24 + $0xa8] sm:$0xff] %v191_v21  ;;  %v197_v24 = vld [vmem:[%s1121_s23 + $0x180] sm:$0xff] }
  0x1d   : > { %194 = vst [vmem:[%s1126_s24 + $0xb0] sm:$0xff] %v193_v22  ;;  %196 = vst [vmem:[%s1126_s24 + $0xb8] sm:$0xff] %v195_v23  ;;  %v199_v25 = vld [vmem:[%s1121_s23 + $0x188] sm:$0xff]  ;;  %v201_v26 = vld [vmem:[%s1121_s23 + $0x190] sm:$0xff] }
  0x1e   : > { %198 = vst [vmem:[%s1126_s24 + $0xc0] sm:$0xff] %v197_v24  ;;  %200 = vst [vmem:[%s1126_s24 + $0xc8] sm:$0xff] %v199_v25  ;;  %v203_v27 = vld [vmem:[%s1121_s23 + $0x198] sm:$0xff]  ;;  %v205_v28 = vld [vmem:[%s1121_s23 + $0x1c0] sm:$0xff] }
  0x1f   : > { %202 = vst [vmem:[%s1126_s24 + $0xd0] sm:$0xff] %v201_v26  ;;  %v207_v29 = vld [vmem:[%s1121_s23 + $0x1c8] sm:$0xff]  ;;  %204 = vst [vmem:[%s1126_s24 + $0xd8] sm:$0xff] %v203_v27  ;;  %v209_v30 = vld [vmem:[%s1121_s23 + $0x1d0] sm:$0xff] }
  0x20   : > { %206 = vst [vmem:[%s1126_s24 + $0xe0] sm:$0xff] %v205_v28  ;;  %208 = vst [vmem:[%s1126_s24 + $0xe8] sm:$0xff] %v207_v29  ;;  %v211_v31 = vld [vmem:[%s1121_s23 + $0x1d8] sm:$0xff]  ;;  %v213_v32 = vld [vmem:[%s1121_s23 + $0x200] sm:$0xff] }
  0x21   : > { %210 = vst [vmem:[%s1126_s24 + $0xf0] sm:$0xff] %v209_v30  ;;  %212 = vst [vmem:[%s1126_s24 + $0xf8] sm:$0xff] %v211_v31  ;;  %v215_v33 = vld [vmem:[%s1121_s23 + $0x208] sm:$0xff]  ;;  %v217_v34 = vld [vmem:[%s1121_s23 + $0x210] sm:$0xff] }
  0x22   : > { %214 = vst [vmem:[%s1126_s24 + $0x100] sm:$0xff] %v213_v32  ;;  %v219_v35 = vld [vmem:[%s1121_s23 + $0x218] sm:$0xff]  ;;  %216 = vst [vmem:[%s1126_s24 + $0x108] sm:$0xff] %v215_v33  ;;  %v221_v36 = vld [vmem:[%s1121_s23 + $0x240] sm:$0xff] }
  0x23   : > { %218 = vst [vmem:[%s1126_s24 + $0x110] sm:$0xff] %v217_v34  ;;  %220 = vst [vmem:[%s1126_s24 + $0x118] sm:$0xff] %v219_v35  ;;  %v223_v37 = vld [vmem:[%s1121_s23 + $0x248] sm:$0xff]  ;;  %v225_v38 = vld [vmem:[%s1121_s23 + $0x250] sm:$0xff] }
  0x24   : > { %222 = vst [vmem:[%s1126_s24 + $0x120] sm:$0xff] %v221_v36  ;;  %224 = vst [vmem:[%s1126_s24 + $0x128] sm:$0xff] %v223_v37  ;;  %v227_v39 = vld [vmem:[%s1121_s23 + $0x258] sm:$0xff]  ;;  %v229_v40 = vld [vmem:[%s1121_s23 + $0x280] sm:$0xff] }
  0x25   : > { %226 = vst [vmem:[%s1126_s24 + $0x130] sm:$0xff] %v225_v38  ;;  %v231_v41 = vld [vmem:[%s1121_s23 + $0x288] sm:$0xff]  ;;  %228 = vst [vmem:[%s1126_s24 + $0x138] sm:$0xff] %v227_v39  ;;  %v233_v42 = vld [vmem:[%s1121_s23 + $0x290] sm:$0xff] }
  0x26   : > { %230 = vst [vmem:[%s1126_s24 + $0x140] sm:$0xff] %v229_v40  ;;  %232 = vst [vmem:[%s1126_s24 + $0x148] sm:$0xff] %v231_v41  ;;  %v235_v43 = vld [vmem:[%s1121_s23 + $0x298] sm:$0xff]  ;;  %v237_v44 = vld [vmem:[%s1121_s23 + $0x2c0] sm:$0xff] }
  0x27   : > { %234 = vst [vmem:[%s1126_s24 + $0x150] sm:$0xff] %v233_v42  ;;  %236 = vst [vmem:[%s1126_s24 + $0x158] sm:$0xff] %v235_v43  ;;  %v239_v45 = vld [vmem:[%s1121_s23 + $0x2c8] sm:$0xff]  ;;  %v241_v46 = vld [vmem:[%s1121_s23 + $0x2d0] sm:$0xff] }
  0x28   : > { %238 = vst [vmem:[%s1126_s24 + $0x160] sm:$0xff] %v237_v44  ;;  %v243_v47 = vld [vmem:[%s1121_s23 + $0x2d8] sm:$0xff]  ;;  %240 = vst [vmem:[%s1126_s24 + $0x168] sm:$0xff] %v239_v45  ;;  %v245_v48 = vld [vmem:[%s1121_s23 + $0x300] sm:$0xff] }
  0x29   : > { %242 = vst [vmem:[%s1126_s24 + $0x170] sm:$0xff] %v241_v46  ;;  %244 = vst [vmem:[%s1126_s24 + $0x178] sm:$0xff] %v243_v47  ;;  %v247_v49 = vld [vmem:[%s1121_s23 + $0x308] sm:$0xff]  ;;  %v249_v50 = vld [vmem:[%s1121_s23 + $0x310] sm:$0xff] }
  0x2a   : > { %246 = vst [vmem:[%s1126_s24 + $0x180] sm:$0xff] %v245_v48  ;;  %248 = vst [vmem:[%s1126_s24 + $0x188] sm:$0xff] %v247_v49  ;;  %v251_v51 = vld [vmem:[%s1121_s23 + $0x318] sm:$0xff]  ;;  %v253_v52 = vld [vmem:[%s1121_s23 + $0x340] sm:$0xff] }
  0x2b   : > { %250 = vst [vmem:[%s1126_s24 + $0x190] sm:$0xff] %v249_v50  ;;  %v255_v53 = vld [vmem:[%s1121_s23 + $0x348] sm:$0xff]  ;;  %252 = vst [vmem:[%s1126_s24 + $0x198] sm:$0xff] %v251_v51  ;;  %v257_v54 = vld [vmem:[%s1121_s23 + $0x350] sm:$0xff] }
  0x2c   : > { %254 = vst [vmem:[%s1126_s24 + $0x1a0] sm:$0xff] %v253_v52  ;;  %256 = vst [vmem:[%s1126_s24 + $0x1a8] sm:$0xff] %v255_v53  ;;  %v259_v55 = vld [vmem:[%s1121_s23 + $0x358] sm:$0xff]  ;;  %v261_v56 = vld [vmem:[%s1121_s23 + $0x380] sm:$0xff] }
  0x2d   : > { %258 = vst [vmem:[%s1126_s24 + $0x1b0] sm:$0xff] %v257_v54  ;;  %260 = vst [vmem:[%s1126_s24 + $0x1b8] sm:$0xff] %v259_v55  ;;  %v263_v57 = vld [vmem:[%s1121_s23 + $0x388] sm:$0xff]  ;;  %v265_v58 = vld [vmem:[%s1121_s23 + $0x390] sm:$0xff] }
  0x2e   : > { %262 = vst [vmem:[%s1126_s24 + $0x1c0] sm:$0xff] %v261_v56  ;;  %v267_v59 = vld [vmem:[%s1121_s23 + $0x398] sm:$0xff]  ;;  %264 = vst [vmem:[%s1126_s24 + $0x1c8] sm:$0xff] %v263_v57  ;;  %v269_v60 = vld [vmem:[%s1121_s23 + $0x3c0] sm:$0xff] }
  0x2f   : > { %266 = vst [vmem:[%s1126_s24 + $0x1d0] sm:$0xff] %v265_v58  ;;  %268 = vst [vmem:[%s1126_s24 + $0x1d8] sm:$0xff] %v267_v59  ;;  %v271_v61 = vld [vmem:[%s1121_s23 + $0x3c8] sm:$0xff]  ;;  %v273_v62 = vld [vmem:[%s1121_s23 + $0x3d0] sm:$0xff] }
  0x30   : > { %270 = vst [vmem:[%s1126_s24 + $0x1e0] sm:$0xff] %v269_v60  ;;  %272 = vst [vmem:[%s1126_s24 + $0x1e8] sm:$0xff] %v271_v61  ;;  %v275_v63 = vld [vmem:[%s1121_s23 + $0x3d8] sm:$0xff]  ;;  %v277_v0 = vld [vmem:[%s1121_s23 + $0x400] sm:$0xff] }
  0x31   : > { %274 = vst [vmem:[%s1126_s24 + $0x1f0] sm:$0xff] %v273_v62  ;;  %v279_v1 = vld [vmem:[%s1121_s23 + $0x408] sm:$0xff]  ;;  %276 = vst [vmem:[%s1126_s24 + $0x1f8] sm:$0xff] %v275_v63  ;;  %v281_v2 = vld [vmem:[%s1121_s23 + $0x410] sm:$0xff] }
  0x32   : > { %278 = vst [vmem:[%s1126_s24 + $0x200] sm:$0xff] %v277_v0  ;;  %280 = vst [vmem:[%s1126_s24 + $0x208] sm:$0xff] %v279_v1  ;;  %v283_v3 = vld [vmem:[%s1121_s23 + $0x418] sm:$0xff]  ;;  %v285_v4 = vld [vmem:[%s1121_s23 + $0x440] sm:$0xff] }
  0x33   : > { %282 = vst [vmem:[%s1126_s24 + $0x210] sm:$0xff] %v281_v2  ;;  %284 = vst [vmem:[%s1126_s24 + $0x218] sm:$0xff] %v283_v3  ;;  %v287_v5 = vld [vmem:[%s1121_s23 + $0x448] sm:$0xff]  ;;  %v289_v6 = vld [vmem:[%s1121_s23 + $0x450] sm:$0xff] }
  0x34   : > { %286 = vst [vmem:[%s1126_s24 + $0x220] sm:$0xff] %v285_v4  ;;  %v291_v7 = vld [vmem:[%s1121_s23 + $0x458] sm:$0xff]  ;;  %288 = vst [vmem:[%s1126_s24 + $0x228] sm:$0xff] %v287_v5  ;;  %v293_v8 = vld [vmem:[%s1121_s23 + $0x480] sm:$0xff] }
  0x35   : > { %290 = vst [vmem:[%s1126_s24 + $0x230] sm:$0xff] %v289_v6  ;;  %292 = vst [vmem:[%s1126_s24 + $0x238] sm:$0xff] %v291_v7  ;;  %v295_v9 = vld [vmem:[%s1121_s23 + $0x488] sm:$0xff]  ;;  %v297_v10 = vld [vmem:[%s1121_s23 + $0x490] sm:$0xff] }
  0x36   : > { %294 = vst [vmem:[%s1126_s24 + $0x240] sm:$0xff] %v293_v8  ;;  %296 = vst [vmem:[%s1126_s24 + $0x248] sm:$0xff] %v295_v9  ;;  %v299_v11 = vld [vmem:[%s1121_s23 + $0x498] sm:$0xff]  ;;  %v301_v12 = vld [vmem:[%s1121_s23 + $0x4c0] sm:$0xff] }
  0x37   : > { %298 = vst [vmem:[%s1126_s24 + $0x250] sm:$0xff] %v297_v10  ;;  %v303_v13 = vld [vmem:[%s1121_s23 + $0x4c8] sm:$0xff]  ;;  %300 = vst [vmem:[%s1126_s24 + $0x258] sm:$0xff] %v299_v11  ;;  %v305_v14 = vld [vmem:[%s1121_s23 + $0x4d0] sm:$0xff] }
  0x38   : > { %302 = vst [vmem:[%s1126_s24 + $0x260] sm:$0xff] %v301_v12  ;;  %304 = vst [vmem:[%s1126_s24 + $0x268] sm:$0xff] %v303_v13  ;;  %v307_v15 = vld [vmem:[%s1121_s23 + $0x4d8] sm:$0xff]  ;;  %v309_v16 = vld [vmem:[%s1121_s23 + $0x500] sm:$0xff] }
  0x39   : > { %306 = vst [vmem:[%s1126_s24 + $0x270] sm:$0xff] %v305_v14  ;;  %308 = vst [vmem:[%s1126_s24 + $0x278] sm:$0xff] %v307_v15  ;;  %v311_v17 = vld [vmem:[%s1121_s23 + $0x508] sm:$0xff]  ;;  %v313_v18 = vld [vmem:[%s1121_s23 + $0x510] sm:$0xff] }
  0x3a   : > { %310 = vst [vmem:[%s1126_s24 + $0x280] sm:$0xff] %v309_v16  ;;  %v315_v19 = vld [vmem:[%s1121_s23 + $0x518] sm:$0xff]  ;;  %312 = vst [vmem:[%s1126_s24 + $0x288] sm:$0xff] %v311_v17  ;;  %v317_v20 = vld [vmem:[%s1121_s23 + $0x540] sm:$0xff] }
  0x3b   : > { %314 = vst [vmem:[%s1126_s24 + $0x290] sm:$0xff] %v313_v18  ;;  %316 = vst [vmem:[%s1126_s24 + $0x298] sm:$0xff] %v315_v19  ;;  %v319_v21 = vld [vmem:[%s1121_s23 + $0x548] sm:$0xff]  ;;  %v321_v22 = vld [vmem:[%s1121_s23 + $0x550] sm:$0xff] }
  0x3c   : > { %318 = vst [vmem:[%s1126_s24 + $0x2a0] sm:$0xff] %v317_v20  ;;  %320 = vst [vmem:[%s1126_s24 + $0x2a8] sm:$0xff] %v319_v21  ;;  %v323_v23 = vld [vmem:[%s1121_s23 + $0x558] sm:$0xff]  ;;  %v325_v24 = vld [vmem:[%s1121_s23 + $0x580] sm:$0xff] }
  0x3d   : > { %322 = vst [vmem:[%s1126_s24 + $0x2b0] sm:$0xff] %v321_v22  ;;  %v327_v25 = vld [vmem:[%s1121_s23 + $0x588] sm:$0xff]  ;;  %324 = vst [vmem:[%s1126_s24 + $0x2b8] sm:$0xff] %v323_v23  ;;  %v329_v26 = vld [vmem:[%s1121_s23 + $0x590] sm:$0xff] }
  0x3e   : > { %326 = vst [vmem:[%s1126_s24 + $0x2c0] sm:$0xff] %v325_v24  ;;  %328 = vst [vmem:[%s1126_s24 + $0x2c8] sm:$0xff] %v327_v25  ;;  %v331_v27 = vld [vmem:[%s1121_s23 + $0x598] sm:$0xff]  ;;  %v333_v28 = vld [vmem:[%s1121_s23 + $0x5c0] sm:$0xff] }
  0x3f   : > { %330 = vst [vmem:[%s1126_s24 + $0x2d0] sm:$0xff] %v329_v26  ;;  %332 = vst [vmem:[%s1126_s24 + $0x2d8] sm:$0xff] %v331_v27  ;;  %v335_v29 = vld [vmem:[%s1121_s23 + $0x5c8] sm:$0xff]  ;;  %v337_v30 = vld [vmem:[%s1121_s23 + $0x5d0] sm:$0xff] }
  0x40   : > { %334 = vst [vmem:[%s1126_s24 + $0x2e0] sm:$0xff] %v333_v28  ;;  %v339_v31 = vld [vmem:[%s1121_s23 + $0x5d8] sm:$0xff]  ;;  %336 = vst [vmem:[%s1126_s24 + $0x2e8] sm:$0xff] %v335_v29  ;;  %v341_v32 = vld [vmem:[%s1121_s23 + $0x600] sm:$0xff] }
  0x41   : > { %338 = vst [vmem:[%s1126_s24 + $0x2f0] sm:$0xff] %v337_v30  ;;  %340 = vst [vmem:[%s1126_s24 + $0x2f8] sm:$0xff] %v339_v31  ;;  %v343_v33 = vld [vmem:[%s1121_s23 + $0x608] sm:$0xff]  ;;  %v345_v34 = vld [vmem:[%s1121_s23 + $0x610] sm:$0xff] }
  0x42   : > { %342 = vst [vmem:[%s1126_s24 + $0x300] sm:$0xff] %v341_v32  ;;  %344 = vst [vmem:[%s1126_s24 + $0x308] sm:$0xff] %v343_v33  ;;  %v347_v35 = vld [vmem:[%s1121_s23 + $0x618] sm:$0xff]  ;;  %v349_v36 = vld [vmem:[%s1121_s23 + $0x640] sm:$0xff] }
  0x43   : > { %346 = vst [vmem:[%s1126_s24 + $0x310] sm:$0xff] %v345_v34  ;;  %v351_v37 = vld [vmem:[%s1121_s23 + $0x648] sm:$0xff]  ;;  %348 = vst [vmem:[%s1126_s24 + $0x318] sm:$0xff] %v347_v35  ;;  %v353_v38 = vld [vmem:[%s1121_s23 + $0x650] sm:$0xff] }
  0x44   : > { %350 = vst [vmem:[%s1126_s24 + $0x320] sm:$0xff] %v349_v36  ;;  %352 = vst [vmem:[%s1126_s24 + $0x328] sm:$0xff] %v351_v37  ;;  %v355_v39 = vld [vmem:[%s1121_s23 + $0x658] sm:$0xff]  ;;  %v357_v40 = vld [vmem:[%s1121_s23 + $0x680] sm:$0xff] }
  0x45   : > { %354 = vst [vmem:[%s1126_s24 + $0x330] sm:$0xff] %v353_v38  ;;  %356 = vst [vmem:[%s1126_s24 + $0x338] sm:$0xff] %v355_v39  ;;  %v359_v41 = vld [vmem:[%s1121_s23 + $0x688] sm:$0xff]  ;;  %v361_v42 = vld [vmem:[%s1121_s23 + $0x690] sm:$0xff] }
  0x46   : > { %358 = vst [vmem:[%s1126_s24 + $0x340] sm:$0xff] %v357_v40  ;;  %v363_v43 = vld [vmem:[%s1121_s23 + $0x698] sm:$0xff]  ;;  %360 = vst [vmem:[%s1126_s24 + $0x348] sm:$0xff] %v359_v41  ;;  %v365_v44 = vld [vmem:[%s1121_s23 + $0x6c0] sm:$0xff] }
  0x47   : > { %362 = vst [vmem:[%s1126_s24 + $0x350] sm:$0xff] %v361_v42  ;;  %364 = vst [vmem:[%s1126_s24 + $0x358] sm:$0xff] %v363_v43  ;;  %v367_v45 = vld [vmem:[%s1121_s23 + $0x6c8] sm:$0xff]  ;;  %v369_v46 = vld [vmem:[%s1121_s23 + $0x6d0] sm:$0xff] }
  0x48   : > { %366 = vst [vmem:[%s1126_s24 + $0x360] sm:$0xff] %v365_v44  ;;  %368 = vst [vmem:[%s1126_s24 + $0x368] sm:$0xff] %v367_v45  ;;  %v371_v47 = vld [vmem:[%s1121_s23 + $0x6d8] sm:$0xff]  ;;  %v373_v48 = vld [vmem:[%s1121_s23 + $0x700] sm:$0xff] }
  0x49   : > { %370 = vst [vmem:[%s1126_s24 + $0x370] sm:$0xff] %v369_v46  ;;  %v375_v49 = vld [vmem:[%s1121_s23 + $0x708] sm:$0xff]  ;;  %372 = vst [vmem:[%s1126_s24 + $0x378] sm:$0xff] %v371_v47  ;;  %v377_v50 = vld [vmem:[%s1121_s23 + $0x710] sm:$0xff] }
  0x4a   : > { %374 = vst [vmem:[%s1126_s24 + $0x380] sm:$0xff] %v373_v48  ;;  %376 = vst [vmem:[%s1126_s24 + $0x388] sm:$0xff] %v375_v49  ;;  %v379_v51 = vld [vmem:[%s1121_s23 + $0x718] sm:$0xff]  ;;  %v381_v52 = vld [vmem:[%s1121_s23 + $0x740] sm:$0xff] }
  0x4b   : > { %378 = vst [vmem:[%s1126_s24 + $0x390] sm:$0xff] %v377_v50  ;;  %380 = vst [vmem:[%s1126_s24 + $0x398] sm:$0xff] %v379_v51  ;;  %v383_v53 = vld [vmem:[%s1121_s23 + $0x748] sm:$0xff]  ;;  %v385_v54 = vld [vmem:[%s1121_s23 + $0x750] sm:$0xff] }
  0x4c   : > { %382 = vst [vmem:[%s1126_s24 + $0x3a0] sm:$0xff] %v381_v52  ;;  %v387_v55 = vld [vmem:[%s1121_s23 + $0x758] sm:$0xff]  ;;  %384 = vst [vmem:[%s1126_s24 + $0x3a8] sm:$0xff] %v383_v53  ;;  %v389_v56 = vld [vmem:[%s1121_s23 + $0x780] sm:$0xff] }
  0x4d   : > { %386 = vst [vmem:[%s1126_s24 + $0x3b0] sm:$0xff] %v385_v54  ;;  %388 = vst [vmem:[%s1126_s24 + $0x3b8] sm:$0xff] %v387_v55  ;;  %v391_v57 = vld [vmem:[%s1121_s23 + $0x788] sm:$0xff]  ;;  %v393_v58 = vld [vmem:[%s1121_s23 + $0x790] sm:$0xff] }
  0x4e   : > { %390 = vst [vmem:[%s1126_s24 + $0x3c0] sm:$0xff] %v389_v56  ;;  %392 = vst [vmem:[%s1126_s24 + $0x3c8] sm:$0xff] %v391_v57  ;;  %v395_v59 = vld [vmem:[%s1121_s23 + $0x798] sm:$0xff]  ;;  %v397_v60 = vld [vmem:[%s1121_s23 + $0x7c0] sm:$0xff] }
  0x4f   : > { %394 = vst [vmem:[%s1126_s24 + $0x3d0] sm:$0xff] %v393_v58  ;;  %v399_v61 = vld [vmem:[%s1121_s23 + $0x7c8] sm:$0xff]  ;;  %396 = vst [vmem:[%s1126_s24 + $0x3d8] sm:$0xff] %v395_v59  ;;  %v401_v62 = vld [vmem:[%s1121_s23 + $0x7d0] sm:$0xff] }
  0x50   : > { %398 = vst [vmem:[%s1126_s24 + $0x3e0] sm:$0xff] %v397_v60  ;;  %400 = vst [vmem:[%s1126_s24 + $0x3e8] sm:$0xff] %v399_v61  ;;  %v403_v63 = vld [vmem:[%s1121_s23 + $0x7d8] sm:$0xff] }
  0x51   : > { %402 = vst [vmem:[%s1126_s24 + $0x3f0] sm:$0xff] %v401_v62  ;;  %404 = vst [vmem:[%s1126_s24 + $0x3f8] sm:$0xff] %v403_v63 }
  0x52 PF: > { %p848_p6 = scmp.ge.s32.totalorder %s1061_s13, 1  ;;  %p409_p7 = scmp.lt.s32.totalorder %s1061_s13, 3 }
  0x54   : > { %p410_p8 = pnand %p848_p6, %p409_p7 }
  0x55   : > { %s416_s25 = sand.u32 (!%p410_p8), 1, %s1045_s9   ;;  %v463_v0 = vld [vmem:[%s1540_s1 + $0x8] sm:$0xff] (!%p410_p8)  ;;  %s850_s4 = sshll.u32 (!%p410_p8), %s1053_s11, 2 }
  0x56   : > { %413 = sbr.rel (%p410_p8) target bundleno = 371 (0x173), region = 47  ;;  %s849_s28 = sshll.u32 (!%p410_p8), %s416_s25, 10  ;;  %656 = vmatprep.mubr.f32.mxu0 (!%p410_p8), %v463_v0  ;;  %727 = vmatprep.mubr.f32.mxu1 (!%p410_p8), %v463_v0 }
  0x57   : > { %s1387_s29 = scalar_lea.vmem (!%p410_p8), [#allocation2], %s849_s28  ;;  %p455_p9 = scmp.lt.s32.totalorder (!%p410_p8), %s850_s4, 7 }
  0x58   : > { %v465_v1 = vld [vmem:[%s1387_s29 + $0x8] sm:$0xff] (!%p410_p8)  ;;  %v464_v3 = vld [vmem:[%s1387_s29] sm:$0xff] (!%p410_p8)  ;;  %v467_v6 = vld [vmem:[%s1387_s29 + $0x18] sm:$0xff] (!%p410_p8) }
  0x59   : > { %v469_v2 = vld [vmem:[%s1387_s29 + $0x28] sm:$0xff] (!%p410_p8)  ;;  %v468_v5 = vld [vmem:[%s1387_s29 + $0x20] sm:$0xff] (!%p410_p8)  ;;  %v471_v7 = vld [vmem:[%s1387_s29 + $0x38] sm:$0xff] (!%p410_p8) }
  0x5a   : > { %v855_v4 = vpack.c.bf16 (!%p410_p8), %v469_v2, %v465_v1  ;;  %v857_v8 = vpack.c.bf16 (!%p410_p8), %v468_v5, %v464_v3  ;;  %v919_v9 = vpack.c.bf16 (!%p410_p8), %v471_v7, %v467_v6  ;;  %v466_v10 = vld [vmem:[%s1387_s29 + $0x10] sm:$0xff] (!%p410_p8)  ;;  %v473_v12 = vld [vmem:[%s1387_s29 + $0x48] sm:$0xff] (!%p410_p8)  ;;  %v472_v15 = vld [vmem:[%s1387_s29 + $0x40] sm:$0xff] (!%p410_p8) }
  0x5b   : > { %v470_v11 = vld [vmem:[%s1387_s29 + $0x30] sm:$0xff] (!%p410_p8)  ;;  %v477_v14 = vld [vmem:[%s1387_s29 + $0x68] sm:$0xff] (!%p410_p8)  ;;  %v476_v16 = vld [vmem:[%s1387_s29 + $0x60] sm:$0xff] (!%p410_p8) }
  0x5c   : > { %856 = vmatprep.subr.bf16.mxu0 (!%p410_p8), %v855_v4  ;;  %v921_v13 = vpack.c.bf16 (!%p410_p8), %v470_v11, %v466_v10  ;;  %920 = vmatprep.subr.bf16.mxu1 (!%p410_p8), %v919_v9  ;;  %v859_v17 = vpack.c.bf16 (!%p410_p8), %v477_v14, %v473_v12  ;;  %v861_v18 = vpack.c.bf16 (!%p410_p8), %v476_v16, %v472_v15  ;;  %v475_v19 = vld [vmem:[%s1387_s29 + $0x58] sm:$0xff] (!%p410_p8)  ;;  %v474_v21 = vld [vmem:[%s1387_s29 + $0x50] sm:$0xff] (!%p410_p8)  ;;  %v481_v24 = vld [vmem:[%s1387_s29 + $0x88] sm:$0xff] (!%p410_p8) }
  0x5d   : > { %858 = vmatpush1.bf16.msra.mxu0 %v857_v8  ;;  %v479_v20 = vld [vmem:[%s1387_s29 + $0x78] sm:$0xff]  ;;  %v478_v23 = vld [vmem:[%s1387_s29 + $0x70] sm:$0xff]  ;;  %v485_v25 = vld [vmem:[%s1387_s29 + $0xa8] sm:$0xff]  ;;  %s1549_s4 = smov (!%p455_p9, %s850_s4), 7 }
  0x5e   : > { %922 = vmatpush1.bf16.msra.mxu1 %v921_v13  ;;  %v923_v22 = vpack.c.bf16 %v479_v20, %v475_v19  ;;  %860 = vmatprep.subr.bf16.mxu0 %v859_v17  ;;  %v925_v26 = vpack.c.bf16 %v478_v23, %v474_v21  ;;  %v863_v27 = vpack.c.bf16 %v485_v25, %v481_v24  ;;  %v480_v28 = vld [vmem:[%s1387_s29 + $0x80] sm:$0xff]  ;;  %v483_v30 = vld [vmem:[%s1387_s29 + $0x98] sm:$0xff]  ;;  %v482_v32 = vld [vmem:[%s1387_s29 + $0x90] sm:$0xff]  ;;  %s851_s5 = sshll.u32 %s1549_s4, 3 }
  0x5f   : > { %v484_v29 = vld [vmem:[%s1387_s29 + $0xa0] sm:$0xff]  ;;  %v487_v31 = vld [vmem:[%s1387_s29 + $0xb8] sm:$0xff]  ;;  %v486_v33 = vld [vmem:[%s1387_s29 + $0xb0] sm:$0xff]  ;;  %s460_s8 = scalar_lea.vmem %s1541_s2, %s851_s5 }
  0x60   : > { %924 = vmatprep.subr.bf16.mxu1 %v923_v22  ;;  %v865_v34 = vpack.c.bf16 %v484_v29, %v480_v28  ;;  %v927_v35 = vpack.c.bf16 %v487_v31, %v483_v30  ;;  %v489_v36 = vld [vmem:[%s1387_s29 + $0xc8] sm:$0xff]  ;;  %v488_v38 = vld [vmem:[%s1387_s29 + $0xc0] sm:$0xff]  ;;  %v929_v39 = vpack.c.bf16 %v486_v33, %v482_v32  ;;  %v491_v42 = vld [vmem:[%s1387_s29 + $0xd8] sm:$0xff] }
  0x61   : > { %862 = vmatpush1.bf16.msra.mxu0 %v861_v18  ;;  %v493_v37 = vld [vmem:[%s1387_s29 + $0xe8] sm:$0xff]  ;;  %v492_v41 = vld [vmem:[%s1387_s29 + $0xe0] sm:$0xff]  ;;  %v495_v43 = vld [vmem:[%s1387_s29 + $0xf8] sm:$0xff] }
  0x62   : > { %926 = vmatpush1.bf16.msra.mxu1 %v925_v26  ;;  %864 = vmatprep.subr.bf16.mxu0 %v863_v27  ;;  %v867_v40 = vpack.c.bf16 %v493_v37, %v489_v36  ;;  %v931_v44 = vpack.c.bf16 %v495_v43, %v491_v42  ;;  %v490_v45 = vld [vmem:[%s1387_s29 + $0xd0] sm:$0xff]  ;;  %v497_v47 = vld [vmem:[%s1387_s29 + $0x108] sm:$0xff]  ;;  %v869_v49 = vpack.c.bf16 %v492_v41, %v488_v38  ;;  %v499_v50 = vld [vmem:[%s1387_s29 + $0x118] sm:$0xff] }
  0x63   : > { %928 = vmatprep.subr.bf16.mxu1 %v927_v35  ;;  %v494_v46 = vld [vmem:[%s1387_s29 + $0xf0] sm:$0xff]  ;;  %v501_v48 = vld [vmem:[%s1387_s29 + $0x128] sm:$0xff]  ;;  %v503_v51 = vld [vmem:[%s1387_s29 + $0x138] sm:$0xff] }
  0x64   : > { %v933_v52 = vpack.c.bf16 %v494_v46, %v490_v45  ;;  %v871_v53 = vpack.c.bf16 %v501_v48, %v497_v47  ;;  %v496_v54 = vld [vmem:[%s1387_s29 + $0x100] sm:$0xff]  ;;  %v498_v56 = vld [vmem:[%s1387_s29 + $0x110] sm:$0xff]  ;;  %v935_v57 = vpack.c.bf16 %v503_v51, %v499_v50  ;;  %v505_v59 = vld [vmem:[%s1387_s29 + $0x148] sm:$0xff] }
  0x65   : > { %866 = vmatpush1.bf16.msra.mxu0 %v865_v34  ;;  %v500_v55 = vld [vmem:[%s1387_s29 + $0x120] sm:$0xff]  ;;  %v502_v58 = vld [vmem:[%s1387_s29 + $0x130] sm:$0xff]  ;;  %v509_v60 = vld [vmem:[%s1387_s29 + $0x168] sm:$0xff] }
  0x66   : > { %930 = vmatpush1.bf16.msra.mxu1 %v929_v39  ;;  %868 = vmatprep.subr.bf16.mxu0 %v867_v40  ;;  %v507_v61 = vld [vmem:[%s1387_s29 + $0x158] sm:$0xff]  ;;  %v873_v63 = vpack.c.bf16 %v500_v55, %v496_v54  ;;  %v937_v0 = vpack.c.bf16 %v502_v58, %v498_v56  ;;  %v875_v1 = vpack.c.bf16 %v509_v60, %v505_v59  ;;  %v504_v2 = vld [vmem:[%s1387_s29 + $0x140] sm:$0xff]  ;;  %v506_v4 = vld [vmem:[%s1387_s29 + $0x150] sm:$0xff] }
  0x67   : > { %932 = vmatprep.subr.bf16.mxu1 %v931_v44  ;;  %v511_v62 = vld [vmem:[%s1387_s29 + $0x178] sm:$0xff]  ;;  %v508_v3 = vld [vmem:[%s1387_s29 + $0x160] sm:$0xff]  ;;  %v510_v6 = vld [vmem:[%s1387_s29 + $0x170] sm:$0xff] }
  0x68   : > { %v939_v5 = vpack.c.bf16 %v511_v62, %v507_v61  ;;  %v513_v7 = vld [vmem:[%s1387_s29 + $0x188] sm:$0xff]  ;;  %v515_v9 = vld [vmem:[%s1387_s29 + $0x198] sm:$0xff]  ;;  %v877_v11 = vpack.c.bf16 %v508_v3, %v504_v2  ;;  %v941_v12 = vpack.c.bf16 %v510_v6, %v506_v4  ;;  %v512_v14 = vld [vmem:[%s1387_s29 + $0x180] sm:$0xff] }
  0x69   : > { %870 = vmatpush1.bf16.msra.mxu0 %v869_v49  ;;  %v517_v8 = vld [vmem:[%s1387_s29 + $0x1a8] sm:$0xff]  ;;  %v519_v10 = vld [vmem:[%s1387_s29 + $0x1b8] sm:$0xff]  ;;  %v516_v15 = vld [vmem:[%s1387_s29 + $0x1a0] sm:$0xff] }
  0x6a   : > { %934 = vmatpush1.bf16.msra.mxu1 %v933_v52  ;;  %872 = vmatprep.subr.bf16.mxu0 %v871_v53  ;;  %v879_v13 = vpack.c.bf16 %v517_v8, %v513_v7  ;;  %v514_v16 = vld [vmem:[%s1387_s29 + $0x190] sm:$0xff]  ;;  %v943_v17 = vpack.c.bf16 %v519_v10, %v515_v9  ;;  %v521_v19 = vld [vmem:[%s1387_s29 + $0x1c8] sm:$0xff]  ;;  %v523_v21 = vld [vmem:[%s1387_s29 + $0x1d8] sm:$0xff]  ;;  %v881_v23 = vpack.c.bf16 %v516_v15, %v512_v14 }
  0x6b   : > { %936 = vmatprep.subr.bf16.mxu1 %v935_v57  ;;  %v518_v18 = vld [vmem:[%s1387_s29 + $0x1b0] sm:$0xff]  ;;  %v525_v20 = vld [vmem:[%s1387_s29 + $0x1e8] sm:$0xff]  ;;  %v527_v22 = vld [vmem:[%s1387_s29 + $0x1f8] sm:$0xff] }
  0x6c   : > { %v945_v24 = vpack.c.bf16 %v518_v18, %v514_v16  ;;  %v883_v25 = vpack.c.bf16 %v525_v20, %v521_v19  ;;  %v520_v26 = vld [vmem:[%s1387_s29 + $0x1c0] sm:$0xff]  ;;  %v522_v28 = vld [vmem:[%s1387_s29 + $0x1d0] sm:$0xff]  ;;  %v947_v29 = vpack.c.bf16 %v527_v22, %v523_v21  ;;  %v529_v31 = vld [vmem:[%s1387_s29 + $0x208] sm:$0xff] }
  0x6d   : > { %874 = vmatpush1.bf16.msra.mxu0 %v873_v63  ;;  %v524_v27 = vld [vmem:[%s1387_s29 + $0x1e0] sm:$0xff]  ;;  %v526_v30 = vld [vmem:[%s1387_s29 + $0x1f0] sm:$0xff]  ;;  %v533_v32 = vld [vmem:[%s1387_s29 + $0x228] sm:$0xff] }
  0x6e   : > { %938 = vmatpush1.bf16.msra.mxu1 %v937_v0  ;;  %876 = vmatprep.subr.bf16.mxu0 %v875_v1  ;;  %v531_v33 = vld [vmem:[%s1387_s29 + $0x218] sm:$0xff]  ;;  %v885_v35 = vpack.c.bf16 %v524_v27, %v520_v26  ;;  %v949_v36 = vpack.c.bf16 %v526_v30, %v522_v28  ;;  %v887_v37 = vpack.c.bf16 %v533_v32, %v529_v31  ;;  %v528_v38 = vld [vmem:[%s1387_s29 + $0x200] sm:$0xff]  ;;  %v530_v40 = vld [vmem:[%s1387_s29 + $0x210] sm:$0xff] }
  0x6f   : > { %940 = vmatprep.subr.bf16.mxu1 %v939_v5  ;;  %v535_v34 = vld [vmem:[%s1387_s29 + $0x238] sm:$0xff]  ;;  %v532_v39 = vld [vmem:[%s1387_s29 + $0x220] sm:$0xff]  ;;  %v534_v42 = vld [vmem:[%s1387_s29 + $0x230] sm:$0xff] }
  0x70   : > { %v951_v41 = vpack.c.bf16 %v535_v34, %v531_v33  ;;  %v537_v43 = vld [vmem:[%s1387_s29 + $0x248] sm:$0xff]  ;;  %v539_v45 = vld [vmem:[%s1387_s29 + $0x258] sm:$0xff]  ;;  %v889_v47 = vpack.c.bf16 %v532_v39, %v528_v38  ;;  %v953_v48 = vpack.c.bf16 %v534_v42, %v530_v40  ;;  %v536_v50 = vld [vmem:[%s1387_s29 + $0x240] sm:$0xff] }
  0x71   : > { %878 = vmatpush1.bf16.msra.mxu0 %v877_v11  ;;  %v541_v44 = vld [vmem:[%s1387_s29 + $0x268] sm:$0xff]  ;;  %v543_v46 = vld [vmem:[%s1387_s29 + $0x278] sm:$0xff]  ;;  %v540_v51 = vld [vmem:[%s1387_s29 + $0x260] sm:$0xff] }
  0x72   : > { %942 = vmatpush1.bf16.msra.mxu1 %v941_v12  ;;  %880 = vmatprep.subr.bf16.mxu0 %v879_v13  ;;  %v891_v49 = vpack.c.bf16 %v541_v44, %v537_v43  ;;  %v538_v52 = vld [vmem:[%s1387_s29 + $0x250] sm:$0xff]  ;;  %v955_v53 = vpack.c.bf16 %v543_v46, %v539_v45  ;;  %v545_v55 = vld [vmem:[%s1387_s29 + $0x288] sm:$0xff]  ;;  %v547_v57 = vld [vmem:[%s1387_s29 + $0x298] sm:$0xff]  ;;  %v893_v59 = vpack.c.bf16 %v540_v51, %v536_v50 }
  0x73   : > { %944 = vmatprep.subr.bf16.mxu1 %v943_v17  ;;  %v542_v54 = vld [vmem:[%s1387_s29 + $0x270] sm:$0xff]  ;;  %v549_v56 = vld [vmem:[%s1387_s29 + $0x2a8] sm:$0xff]  ;;  %v551_v58 = vld [vmem:[%s1387_s29 + $0x2b8] sm:$0xff] }
  0x74   : > { %v957_v60 = vpack.c.bf16 %v542_v54, %v538_v52  ;;  %v895_v61 = vpack.c.bf16 %v549_v56, %v545_v55  ;;  %v544_v62 = vld [vmem:[%s1387_s29 + $0x280] sm:$0xff]  ;;  %v546_v0 = vld [vmem:[%s1387_s29 + $0x290] sm:$0xff]  ;;  %v959_v1 = vpack.c.bf16 %v551_v58, %v547_v57  ;;  %v553_v3 = vld [vmem:[%s1387_s29 + $0x2c8] sm:$0xff] }
  0x75   : > { %882 = vmatpush1.bf16.msra.mxu0 %v881_v23  ;;  %v548_v63 = vld [vmem:[%s1387_s29 + $0x2a0] sm:$0xff]  ;;  %v550_v2 = vld [vmem:[%s1387_s29 + $0x2b0] sm:$0xff]  ;;  %v557_v4 = vld [vmem:[%s1387_s29 + $0x2e8] sm:$0xff] }
  0x76   : > { %946 = vmatpush1.bf16.msra.mxu1 %v945_v24  ;;  %884 = vmatprep.subr.bf16.mxu0 %v883_v25  ;;  %v555_v5 = vld [vmem:[%s1387_s29 + $0x2d8] sm:$0xff]  ;;  %v897_v7 = vpack.c.bf16 %v548_v63, %v544_v62  ;;  %v961_v8 = vpack.c.bf16 %v550_v2, %v546_v0  ;;  %v899_v9 = vpack.c.bf16 %v557_v4, %v553_v3  ;;  %v552_v10 = vld [vmem:[%s1387_s29 + $0x2c0] sm:$0xff]  ;;  %v554_v12 = vld [vmem:[%s1387_s29 + $0x2d0] sm:$0xff] }
  0x77   : > { %948 = vmatprep.subr.bf16.mxu1 %v947_v29  ;;  %v559_v6 = vld [vmem:[%s1387_s29 + $0x2f8] sm:$0xff]  ;;  %v556_v11 = vld [vmem:[%s1387_s29 + $0x2e0] sm:$0xff]  ;;  %v558_v14 = vld [vmem:[%s1387_s29 + $0x2f0] sm:$0xff] }
  0x78   : > { %v963_v13 = vpack.c.bf16 %v559_v6, %v555_v5  ;;  %v561_v15 = vld [vmem:[%s1387_s29 + $0x308] sm:$0xff]  ;;  %v563_v17 = vld [vmem:[%s1387_s29 + $0x318] sm:$0xff]  ;;  %v901_v19 = vpack.c.bf16 %v556_v11, %v552_v10  ;;  %v965_v20 = vpack.c.bf16 %v558_v14, %v554_v12  ;;  %v560_v22 = vld [vmem:[%s1387_s29 + $0x300] sm:$0xff] }
  0x79   : > { %886 = vmatpush1.bf16.msra.mxu0 %v885_v35  ;;  %v565_v16 = vld [vmem:[%s1387_s29 + $0x328] sm:$0xff]  ;;  %v567_v18 = vld [vmem:[%s1387_s29 + $0x338] sm:$0xff]  ;;  %v564_v23 = vld [vmem:[%s1387_s29 + $0x320] sm:$0xff] }
  0x7a   : > { %950 = vmatpush1.bf16.msra.mxu1 %v949_v36  ;;  %888 = vmatprep.subr.bf16.mxu0 %v887_v37  ;;  %v903_v21 = vpack.c.bf16 %v565_v16, %v561_v15  ;;  %v562_v24 = vld [vmem:[%s1387_s29 + $0x310] sm:$0xff]  ;;  %v967_v25 = vpack.c.bf16 %v567_v18, %v563_v17  ;;  %v569_v27 = vld [vmem:[%s1387_s29 + $0x348] sm:$0xff]  ;;  %v571_v29 = vld [vmem:[%s1387_s29 + $0x358] sm:$0xff]  ;;  %v905_v31 = vpack.c.bf16 %v564_v23, %v560_v22 }
  0x7b   : > { %952 = vmatprep.subr.bf16.mxu1 %v951_v41  ;;  %v566_v26 = vld [vmem:[%s1387_s29 + $0x330] sm:$0xff]  ;;  %v573_v28 = vld [vmem:[%s1387_s29 + $0x368] sm:$0xff]  ;;  %v575_v30 = vld [vmem:[%s1387_s29 + $0x378] sm:$0xff] }
  0x7c   : > { %v969_v32 = vpack.c.bf16 %v566_v26, %v562_v24  ;;  %v907_v33 = vpack.c.bf16 %v573_v28, %v569_v27  ;;  %v568_v34 = vld [vmem:[%s1387_s29 + $0x340] sm:$0xff]  ;;  %v570_v36 = vld [vmem:[%s1387_s29 + $0x350] sm:$0xff]  ;;  %v971_v37 = vpack.c.bf16 %v575_v30, %v571_v29  ;;  %v577_v39 = vld [vmem:[%s1387_s29 + $0x388] sm:$0xff] }
  0x7d   : > { %890 = vmatpush1.bf16.msra.mxu0 %v889_v47  ;;  %v572_v35 = vld [vmem:[%s1387_s29 + $0x360] sm:$0xff]  ;;  %v574_v38 = vld [vmem:[%s1387_s29 + $0x370] sm:$0xff]  ;;  %v581_v40 = vld [vmem:[%s1387_s29 + $0x3a8] sm:$0xff] }
  0x7e   : > { %954 = vmatpush1.bf16.msra.mxu1 %v953_v48  ;;  %892 = vmatprep.subr.bf16.mxu0 %v891_v49  ;;  %v579_v41 = vld [vmem:[%s1387_s29 + $0x398] sm:$0xff]  ;;  %v909_v43 = vpack.c.bf16 %v572_v35, %v568_v34  ;;  %v973_v44 = vpack.c.bf16 %v574_v38, %v570_v36  ;;  %v911_v45 = vpack.c.bf16 %v581_v40, %v577_v39  ;;  %v576_v46 = vld [vmem:[%s1387_s29 + $0x380] sm:$0xff]  ;;  %v578_v48 = vld [vmem:[%s1387_s29 + $0x390] sm:$0xff] }
  0x7f   : > { %956 = vmatprep.subr.bf16.mxu1 %v955_v53  ;;  %v583_v42 = vld [vmem:[%s1387_s29 + $0x3b8] sm:$0xff]  ;;  %v580_v47 = vld [vmem:[%s1387_s29 + $0x3a0] sm:$0xff]  ;;  %v582_v50 = vld [vmem:[%s1387_s29 + $0x3b0] sm:$0xff] }
  0x80   : > { %v975_v49 = vpack.c.bf16 %v583_v42, %v579_v41  ;;  %v585_v51 = vld [vmem:[%s1387_s29 + $0x3c8] sm:$0xff]  ;;  %v587_v53 = vld [vmem:[%s1387_s29 + $0x3d8] sm:$0xff]  ;;  %v913_v55 = vpack.c.bf16 %v580_v47, %v576_v46  ;;  %v977_v56 = vpack.c.bf16 %v582_v50, %v578_v48  ;;  %v584_v58 = vld [vmem:[%s1387_s29 + $0x3c0] sm:$0xff] }
  0x81   : > { %894 = vmatpush1.bf16.msra.mxu0 %v893_v59  ;;  %v589_v52 = vld [vmem:[%s1387_s29 + $0x3e8] sm:$0xff]  ;;  %v591_v54 = vld [vmem:[%s1387_s29 + $0x3f8] sm:$0xff]  ;;  %v588_v59 = vld [vmem:[%s1387_s29 + $0x3e0] sm:$0xff] }
  0x82   : > { %958 = vmatpush1.bf16.msra.mxu1 %v957_v60  ;;  %896 = vmatprep.subr.bf16.mxu0 %v895_v61  ;;  %v915_v57 = vpack.c.bf16 %v589_v52, %v585_v51  ;;  %v979_v60 = vpack.c.bf16 %v591_v54, %v587_v53  ;;  %v586_v61 = vld [vmem:[%s1387_s29 + $0x3d0] sm:$0xff]  ;;  %v917_v63 = vpack.c.bf16 %v588_v59, %v584_v58 }
  0x83   : > { %960 = vmatprep.subr.bf16.mxu1 %v959_v1  ;;  %v590_v62 = vld [vmem:[%s1387_s29 + $0x3f0] sm:$0xff]  ;;  %v462_v1 = vld [vmem:[%s1540_s1] sm:$0xff] }
  0x84   : > { %v981_v0 = vpack.c.bf16 %v590_v62, %v586_v61 }
  0x85   : > { %898 = vmatpush1.bf16.msra.mxu0 %v897_v7 }
  0x86   : > { %962 = vmatpush1.bf16.msra.mxu1 %v961_v8  ;;  %900 = vmatprep.subr.bf16.mxu0 %v899_v9 }
  0x87   : > { %964 = vmatprep.subr.bf16.mxu1 %v963_v13 }
  0x89   : > { %902 = vmatpush1.bf16.msra.mxu0 %v901_v19 }
  0x8a   : > { %966 = vmatpush1.bf16.msra.mxu1 %v965_v20  ;;  %904 = vmatprep.subr.bf16.mxu0 %v903_v21 }
  0x8b   : > { %968 = vmatprep.subr.bf16.mxu1 %v967_v25 }
  0x8d   : > { %906 = vmatpush1.bf16.msra.mxu0 %v905_v31 }
  0x8e   : > { %970 = vmatpush1.bf16.msra.mxu1 %v969_v32  ;;  %908 = vmatprep.subr.bf16.mxu0 %v907_v33 }
  0x8f   : > { %972 = vmatprep.subr.bf16.mxu1 %v971_v37 }
  0x91   : > { %910 = vmatpush1.bf16.msra.mxu0 %v909_v43 }
  0x92   : > { %974 = vmatpush1.bf16.msra.mxu1 %v973_v44  ;;  %912 = vmatprep.subr.bf16.mxu0 %v911_v45 }
  0x93   : > { %976 = vmatprep.subr.bf16.mxu1 %v975_v49 }
  0x95   : > { %914 = vmatpush1.bf16.msra.mxu0 %v913_v55 }
  0x96   : > { %978 = vmatpush1.bf16.msra.mxu1 %v977_v56  ;;  %916 = vmatprep.subr.bf16.mxu0 %v915_v57 }
  0x97   : > { %980 = vmatprep.subr.bf16.mxu1 %v979_v60 }
  0x99   : > { %918 = vmatpush1.bf16.msra.mxu0 %v917_v63 }
  0x9a   : > { %982 = vmatpush1.bf16.msra.mxu1 %v981_v0 }
  0x9c   : > { %657 = vmatmul.mubr.f32.vlgmr.msra.gmra.mrb[0].mxu0 %v462_v1 }
  0x9d   : > { %728 = vmatmul.mubr.f32.vlgmr.msra.gmra.mrb[0].mxu1 %v462_v1 }
 0x16f   : > { %v658_v2 = vpop.f32.mrb[0].mxu0 }
 0x170   : > { %734 = vst [vmem:[%s460_s8] sm:$0xff] %v658_v2  ;;  %v660_v3 = vpop.f32.mrb[1].mxu0  ;;  %v729_v4 = vpop.f32.mrb[0].mxu1 }
 0x171   : > { %735 = vst [vmem:[%s460_s8 + $0x8] sm:$0xff] %v660_v3  ;;  %v731_v5 = vpop.f32.mrb[1].mxu1  ;;  %736 = vst [vmem:[%s460_s8 + $0x10] sm:$0xff] %v729_v4 }
 0x172   : > { %737 = vst [vmem:[%s460_s8 + $0x18] sm:$0xff] %v731_v5 }
 0x173 PF: > { %s12_s13 = sadd.s32 1, %s1061_s13   ;;  %s1542_s9 = smov %s1049_s10 }
 0x174   : > { %p9_p10 = scmp.ge.s32.totalorder %s12_s13, 4   ;;  %s1543_s10 = smov %s1113_s17 }
 0x175   : > { %s1544_s11 = smov %s1057_s12  ;;  %s1545_s12 = smov %s1547_s14 }
 0x176   :  { %11 = sbr.rel (!%p9_p10) target bundleno = 3 (0x3), region = 89 }

</bundles_post_ra>
